<compile_context>
chip_gen: v5e
topology: v5e:2x2
jax: 0.10.0
libtpu: 0.0.40
codegen_flags: <defaults>
</compile_context>

<pallas_src>
import functools
import math

import jax
import jax.numpy as jnp
from jax.experimental import pallas as pl
from jax.experimental.pallas import tpu as pltpu

F32 = jnp.float32
BF16 = jnp.bfloat16
BN_EPS = 1e-5

# Byte budget for the live, double-buffered VMEM tiles (leaves headroom on
# v7x's 64 MiB per-TensorCore VMEM; v5e/v6e have 128 MiB).
VMEM_TILE_BUDGET = 40 * 1024 * 1024


def _round_up(x, m):
    return (x + m - 1) // m * m


def _tile_bytes(shape, itemsize):
    """VMEM footprint of one buffered tile, including (8,128) layout padding."""
    *lead, s2, s1 = shape
    return math.prod(lead or [1]) * _round_up(s2, 8) * _round_up(s1, 128) * itemsize


def _pick_row_tile(ho, wo, batch, n_tiles, max_rows):
    """Largest output-row tile (divisor of Ho, within the VMEM row budget) that
    still leaves enough grid steps (>=8 preferred) to hide DMA behind compute
    and keep both v7x TensorCores busy."""
    divs = [d for d in range(1, ho + 1) if ho % d == 0 and d * wo <= max_rows] or [1]
    for min_steps in (8, 4, 2, 1):
        cands = [d for d in divs if batch * (ho // d) * n_tiles >= min_steps]
        if cands:
            return max(cands)
    return divs[0]


# ---------------------------------------------------------------------------
# Pallas kernel: fused (in-kernel im2col) conv + folded-BN bias + ReLU.
# ---------------------------------------------------------------------------
def _conv_bn_relu_kernel(x_ref, w_ref, b_ref, o_ref, *, kq, th, wo):
    """One grid step = `th` output rows x `wo` output cols x `tn` channels.

    x_ref : (1, H', W', Cin_eff) bf16  -- full padded image, VMEM-resident
    w_ref : (kq*kq, Cin_eff, tn) bf16  -- folded conv*BN weights (this N tile)
    b_ref : (1, tn)              f32   -- folded BN bias (this N tile)
    o_ref : (1, th, wo, tn)            -- ReLU(conv + bias)
    """
    band = pl.program_id(2)
    cin_eff = x_ref.shape[3]
    tn = o_ref.shape[3]
    row0 = band * th

    acc = jnp.zeros((th * wo, tn), jnp.float32)
    # In-kernel im2col: slice each tap straight out of the VMEM-resident image
    # (unit-stride, dynamic row start) and accumulate MXU matmuls in f32.
    for qi in range(kq):
        for qj in range(kq):
            xt = x_ref[0, pl.ds(row0 + qi, th), pl.ds(qj, wo), :]     # (th, wo, cin_eff)
            acc = acc + jnp.dot(xt.reshape(th * wo, cin_eff),
                                w_ref[qi * kq + qj],
                                preferred_element_type=jnp.float32)

    y = jnp.maximum(acc + b_ref[...], 0.0)                            # bias + ReLU
    o_ref[...] = y.reshape(1, th, wo, tn).astype(o_ref.dtype)


def _fused_conv_call(x, w_eff, b_pad, *, kq, ho, wo, out_dtype):
    batch, hq, wq, cin_eff = x.shape
    n_taps, cin_eff_w, n_pad = w_eff.shape
    assert n_taps == kq * kq and cin_eff_w == cin_eff
    out_isize = jnp.dtype(out_dtype).itemsize

    tn = 256 if (n_pad % 256 == 0) else 128          # lane-dense output tiles
    nt = n_pad // tn

    # Explicit VMEM byte budget drives the tiling (double-buffered tiles).
    fixed = 2 * (_tile_bytes((1, hq, wq, cin_eff), 2) +
                 _tile_bytes((n_taps, cin_eff, tn), 2) +
                 _tile_bytes((1, tn), 4))
    if fixed >= VMEM_TILE_BUDGET:
        # TODO(synk): halo-banded manual-DMA variant (make_async_copy over row
        # bands) for images too large to stay VMEM-resident per batch element.
        raise ValueError("padded image does not fit the VMEM residency budget")
    max_rows = max(8, (VMEM_TILE_BUDGET - fixed) // (2 * _round_up(tn, 128) * out_isize))
    th = _pick_row_tile(ho, wo, batch, nt, max_rows)
    rb = ho // th
    need = fixed + 2 * _tile_bytes((1, th, wo, tn), out_isize)

    kernel = functools.partial(_conv_bn_relu_kernel, kq=kq, th=th, wo=wo)
    return pl.pallas_call(
        kernel,
        out_shape=jax.ShapeDtypeStruct((batch, ho, wo, n_pad), out_dtype),
        grid_spec=pltpu.PrefetchScalarGridSpec(
            num_scalar_prefetch=0,
            # Row-band axis innermost: the image block (index depends only on b)
            # and weight/bias blocks (index depends only on n) stay resident
            # across it, so per step only the lane-dense output tile moves.
            grid=(batch, nt, rb),
            in_specs=[
                pl.BlockSpec((1, hq, wq, cin_eff), lambda b, n, r: (b, 0, 0, 0)),
                pl.BlockSpec((n_taps, cin_eff, tn), lambda b, n, r: (0, 0, n)),
                pl.BlockSpec((1, tn), lambda b, n, r: (0, n)),
            ],
            out_specs=pl.BlockSpec((1, th, wo, tn), lambda b, n, r: (b, r, 0, n)),
        ),
        compiler_params=pltpu.CompilerParams(
            dimension_semantics=("parallel", "parallel", "parallel"),
            vmem_limit_bytes=int(min(max(2 * need, 16 << 20), 48 << 20)),
        ),
    )(x, w_eff, b_pad)


# ---------------------------------------------------------------------------
# Forward wrappers (layout prep only; all arithmetic is inside the kernel).
# ---------------------------------------------------------------------------
def _conv_bn_act_nhwc(x, w_eff, b_pad, *, kernel_size, stride, out_chs, out_dtype):
    k, s = kernel_size, stride
    batch, h, w, cin = x.shape
    p = k // 2
    cin_pad = _round_up(cin, 8)
    kq = (k - 1) // s + 1
    ho = (h + 2 * p - k) // s + 1
    wo = (w + 2 * p - k) // s + 1
    hp = _round_up(max(h + 2 * p, s * (kq - 1 + ho)), s)
    wp = _round_up(max(w + 2 * p, s * (kq - 1 + wo)), s)

    x = x.astype(BF16)                       # single bf16 cast, before padding
    x = jnp.pad(x, ((0, 0), (p, hp - h - p), (p, wp - w - p), (0, cin_pad - cin)))
    if s > 1:
        # Space-to-depth: a stride-s conv becomes a stride-1 kq x kq conv over
        # s*s*Cin channels (weights re-packed to match at init), so the kernel
        # never needs strided reads.
        x = x.reshape(batch, hp // s, s, wp // s, s, cin_pad)
        x = x.transpose(0, 1, 3, 2, 4, 5).reshape(batch, hp // s, wp // s, s * s * cin_pad)

    y = _fused_conv_call(x, w_eff, b_pad, kq=kq, ho=ho, wo=wo, out_dtype=out_dtype)
    # Real networks use Cout % 128 == 0 so this is a no-op; for the toy Cout=32
    # it trims the lane padding that was added for dense (unmasked) stores.
    return y if y.shape[-1] == out_chs else y[..., :out_chs]


@functools.partial(jax.jit, static_argnames=("kernel_size", "stride", "out_chs", "out_dtype"))
def conv_bn_act_forward_nhwc(x_nhwc, w_eff, b_pad, *, kernel_size, stride, out_chs,
                             out_dtype=F32):
    """Recommended entry point: NHWC in / NHWC out, no layout transposes."""
    return _conv_bn_act_nhwc(x_nhwc, w_eff, b_pad, kernel_size=kernel_size,
                             stride=stride, out_chs=out_chs, out_dtype=out_dtype)


@functools.partial(jax.jit, static_argnames=("kernel_size", "stride", "out_chs"))
def conv_bn_act_forward(x_nchw, w_eff, b_pad, *, kernel_size, stride, out_chs):
    """PyTorch-parity entry point (NCHW in / NCHW out).  The two transposes are
    boundary layout glue only; NHWC-native stacks should use the NHWC API."""
    x = jnp.transpose(x_nchw.astype(BF16), (0, 2, 3, 1))
    y = _conv_bn_act_nhwc(x, w_eff, b_pad, kernel_size=kernel_size, stride=stride,
                          out_chs=out_chs, out_dtype=F32)
    return jnp.transpose(y, (0, 3, 1, 2))


# ---------------------------------------------------------------------------
# Parameters (synthetic, deterministic).  BN folded + weights packed at init.
# ---------------------------------------------------------------------------
def init_params(key, in_chs, out_chs, kernel_size, stride=1):
    k1, k2, k3, k4, k5 = jax.random.split(key, 5)
    k, s = kernel_size, stride
    fan_in = in_chs * k * k
    w_hwio = jax.random.normal(k1, (k, k, in_chs, out_chs), F32) * (1.0 / math.sqrt(fan_in))
    gamma = 1.0 + 0.1 * jax.random.normal(k2, (out_chs,), F32)
    beta = 0.1 * jax.random.normal(k3, (out_chs,), F32)
    mean = 0.1 * jax.random.normal(k4, (out_chs,), F32)
    var = 1.0 + 0.1 * jax.random.uniform(k5, (out_chs,), F32)

    # Fold inference-mode BatchNorm into the conv weight/bias ONCE here.
    scale = gamma * jax.lax.rsqrt(var + BN_EPS)
    b_fold = beta - mean * scale
    wf = w_hwio * scale                                           # (k, k, cin, cout)

    # Re-pack for the kernel: stride -> space-to-depth phases, Cin padded to a
    # multiple of 8 (sublane), Cout padded to a multiple of 128 (lane-dense
    # stores / full MXU N), taps flattened, weight pre-cast to bf16.
    cin_pad = _round_up(in_chs, 8)
    n_pad = _round_up(out_chs, 128)
    kq = (k - 1) // s + 1
    w_eff = jnp.zeros((kq, kq, s, s, cin_pad, n_pad), F32)
    for ki in range(k):
        qi, ri = divmod(ki, s)
        for kj in range(k):
            qj, rj = divmod(kj, s)
            w_eff = w_eff.at[qi, qj, ri, rj, :in_chs, :out_chs].set(wf[ki, kj])
    w_eff = w_eff.reshape(kq * kq, s * s * cin_pad, n_pad).astype(BF16)
    b_pad = jnp.zeros((1, n_pad), F32).at[0, :out_chs].set(b_fold)

    # TODO(synk): training-mode BatchNorm (batch statistics + running-stat
    # updates) is not implemented; this is the inference-mode forward pass.
    return {
        "kernel_size": k, "stride": s, "out_chs": out_chs,
        "w_hwio": w_hwio, "bn": (gamma, beta, mean, var),
        "w_eff": w_eff, "b_pad": b_pad,
    }


# ---------------------------------------------------------------------------
# Pure-JAX reference (unfused conv -> BN -> ReLU) for correctness checking.
# ---------------------------------------------------------------------------
def conv_bn_act_ref(x_nchw, params):
    k, s = params["kernel_size"], params["stride"]
    gamma, beta, mean, var = params["bn"]
    p = k // 2
    x = jnp.transpose(x_nchw.astype(F32), (0, 2, 3, 1))
    y = jax.lax.conv_general_dilated(
        x, params["w_hwio"], window_strides=(s, s),
        padding=[(p, p), (p, p)],
        dimension_numbers=("NHWC", "HWIO", "NHWC"))
    y = (y - mean) * (gamma * jax.lax.rsqrt(var + BN_EPS)) + beta
    y = jnp.maximum(y, 0.0)
    return jnp.transpose(y, (0, 3, 1, 2))


if __name__ == "__main__":
    B, Cin, H, W = 2, 4, 16, 16
    kx, kp = jax.random.split(jax.random.PRNGKey(0))
    x = jax.random.normal(kx, (B, Cin, H, W), F32)

    configs = [
        dict(out_chs=32, kernel_size=3, stride=1),   # standard 3x3 ConvBnAct
        dict(out_chs=32, kernel_size=1, stride=1),   # 1x1 (pointwise) ConvBnAct
        dict(out_chs=32, kernel_size=3, stride=2),   # strided 3x3 ConvBnAct
    ]
    keys = jax.random.split(kp, len(configs))
    for cfg, key in zip(configs, keys):
        params = init_params(key, Cin, cfg["out_chs"], cfg["kernel_size"], cfg["stride"])
        out = conv_bn_act_forward(
            x, params["w_eff"], params["b_pad"],
            kernel_size=cfg["kernel_size"], stride=cfg["stride"], out_chs=cfg["out_chs"])
        out = jax.block_until_ready(out)
        ref = conv_bn_act_ref(x, params)
        assert out.shape == ref.shape, (out.shape, ref.shape)
        assert bool(jnp.all(jnp.isfinite(out)))
        # bf16 matmul inputs with f32 accumulate: abs error grows ~sqrt(k*k*Cin)
        # (documented; fine for inference).
        max_err = float(jnp.max(jnp.abs(out - ref)))
        assert max_err < 1e-1, f"mismatch vs reference: max_err={max_err}"
    print("KERNEL_OK")
</pallas_src>

<mosaic_0001>
module attributes {stable_mosaic.version = 11 : i64} {
  func.func @_conv_bn_relu_kernel(%arg0: i32, %arg1: i32, %arg2: i32, %arg3: memref<1x18x18x8xbf16, #tpu.memory_space<vmem>>, %arg4: memref<9x8x128xbf16, #tpu.memory_space<vmem>>, %arg5: memref<1x128xf32, #tpu.memory_space<vmem>>, %arg6: memref<1x4x16x128xf32, #tpu.memory_space<vmem>>) attributes {dimension_semantics = [#tpu.dimension_semantics<parallel>, #tpu.dimension_semantics<parallel>, #tpu.dimension_semantics<parallel>], iteration_bounds = array<i64: 2, 1, 4>, scalar_prefetch = 0 : i64, scratch_operands = 0 : i64, tpu.core_type = #tpu.core_type<tc>, window_params = [{transform_indices = @transform_0, window_bounds = array<i64: 1, 18, 18, 8>}, {transform_indices = @transform_1, window_bounds = array<i64: 9, 8, 128>}, {transform_indices = @transform_2, window_bounds = array<i64: 1, 128>}, {transform_indices = @transform_3, window_bounds = array<i64: 1, 4, 16, 128>}]} {
    %c4_i32 = arith.constant 4 : i32
    %0 = arith.muli %arg2, %c4_i32 : i32
    %cst = arith.constant 0.000000e+00 : f32
    %1 = vector.broadcast %cst : f32 to vector<64x128xf32>
    %c0_i32 = arith.constant 0 : i32
    %2 = arith.addi %0, %c0_i32 : i32
    %c0 = arith.constant 0 : index
    %3 = arith.index_cast %2 : i32 to index
    %c0_0 = arith.constant 0 : index
    %c0_1 = arith.constant 0 : index
    %4 = vector.load %arg3[%c0, %3, %c0_0, %c0_1] : memref<1x18x18x8xbf16, #tpu.memory_space<vmem>>, vector<1x4x16x8xbf16>
    %5 = vector.shape_cast %4 : vector<1x4x16x8xbf16> to vector<4x16x8xbf16>
    %6 = vector.shape_cast %5 : vector<4x16x8xbf16> to vector<64x8xbf16>
    %c0_2 = arith.constant 0 : index
    %c0_3 = arith.constant 0 : index
    %c0_4 = arith.constant 0 : index
    %7 = vector.load %arg4[%c0_2, %c0_3, %c0_4] : memref<9x8x128xbf16, #tpu.memory_space<vmem>>, vector<1x8x128xbf16>
    %8 = vector.shape_cast %7 : vector<1x8x128xbf16> to vector<8x128xbf16>
    %cst_5 = arith.constant dense<0.000000e+00> : vector<64x128xf32>
    %9 = tpu.matmul %6, %8, %cst_5 {dimension_numbers = #tpu.dot_dimension_numbers<[1], [0], [0], [1], [0, 0, 1, 1], [], []>} : vector<64x8xbf16>, vector<8x128xbf16>, vector<64x128xf32> -> vector<64x128xf32>
    %10 = arith.addf %1, %9 : vector<64x128xf32>
    %c0_i32_6 = arith.constant 0 : i32
    %11 = arith.addi %0, %c0_i32_6 : i32
    %c0_7 = arith.constant 0 : index
    %12 = arith.index_cast %11 : i32 to index
    %c1 = arith.constant 1 : index
    %c0_8 = arith.constant 0 : index
    %13 = vector.load %arg3[%c0_7, %12, %c1, %c0_8] : memref<1x18x18x8xbf16, #tpu.memory_space<vmem>>, vector<1x4x16x8xbf16>
    %14 = vector.shape_cast %13 : vector<1x4x16x8xbf16> to vector<4x16x8xbf16>
    %15 = vector.shape_cast %14 : vector<4x16x8xbf16> to vector<64x8xbf16>
    %c1_9 = arith.constant 1 : index
    %c0_10 = arith.constant 0 : index
    %c0_11 = arith.constant 0 : index
    %16 = vector.load %arg4[%c1_9, %c0_10, %c0_11] : memref<9x8x128xbf16, #tpu.memory_space<vmem>>, vector<1x8x128xbf16>
    %17 = vector.shape_cast %16 : vector<1x8x128xbf16> to vector<8x128xbf16>
    %cst_12 = arith.constant dense<0.000000e+00> : vector<64x128xf32>
    %18 = tpu.matmul %15, %17, %cst_12 {dimension_numbers = #tpu.dot_dimension_numbers<[1], [0], [0], [1], [0, 0, 1, 1], [], []>} : vector<64x8xbf16>, vector<8x128xbf16>, vector<64x128xf32> -> vector<64x128xf32>
    %19 = arith.addf %10, %18 : vector<64x128xf32>
    %c0_i32_13 = arith.constant 0 : i32
    %20 = arith.addi %0, %c0_i32_13 : i32
    %c0_14 = arith.constant 0 : index
    %21 = arith.index_cast %20 : i32 to index
    %c2 = arith.constant 2 : index
    %c0_15 = arith.constant 0 : index
    %22 = vector.load %arg3[%c0_14, %21, %c2, %c0_15] : memref<1x18x18x8xbf16, #tpu.memory_space<vmem>>, vector<1x4x16x8xbf16>
    %23 = vector.shape_cast %22 : vector<1x4x16x8xbf16> to vector<4x16x8xbf16>
    %24 = vector.shape_cast %23 : vector<4x16x8xbf16> to vector<64x8xbf16>
    %c2_16 = arith.constant 2 : index
    %c0_17 = arith.constant 0 : index
    %c0_18 = arith.constant 0 : index
    %25 = vector.load %arg4[%c2_16, %c0_17, %c0_18] : memref<9x8x128xbf16, #tpu.memory_space<vmem>>, vector<1x8x128xbf16>
    %26 = vector.shape_cast %25 : vector<1x8x128xbf16> to vector<8x128xbf16>
    %cst_19 = arith.constant dense<0.000000e+00> : vector<64x128xf32>
    %27 = tpu.matmul %24, %26, %cst_19 {dimension_numbers = #tpu.dot_dimension_numbers<[1], [0], [0], [1], [0, 0, 1, 1], [], []>} : vector<64x8xbf16>, vector<8x128xbf16>, vector<64x128xf32> -> vector<64x128xf32>
    %28 = arith.addf %19, %27 : vector<64x128xf32>
    %c1_i32 = arith.constant 1 : i32
    %29 = arith.addi %0, %c1_i32 : i32
    %c0_20 = arith.constant 0 : index
    %30 = arith.index_cast %29 : i32 to index
    %c0_21 = arith.constant 0 : index
    %c0_22 = arith.constant 0 : index
    %31 = vector.load %arg3[%c0_20, %30, %c0_21, %c0_22] : memref<1x18x18x8xbf16, #tpu.memory_space<vmem>>, vector<1x4x16x8xbf16>
    %32 = vector.shape_cast %31 : vector<1x4x16x8xbf16> to vector<4x16x8xbf16>
    %33 = vector.shape_cast %32 : vector<4x16x8xbf16> to vector<64x8xbf16>
    %c3 = arith.constant 3 : index
    %c0_23 = arith.constant 0 : index
    %c0_24 = arith.constant 0 : index
    %34 = vector.load %arg4[%c3, %c0_23, %c0_24] : memref<9x8x128xbf16, #tpu.memory_space<vmem>>, vector<1x8x128xbf16>
    %35 = vector.shape_cast %34 : vector<1x8x128xbf16> to vector<8x128xbf16>
    %cst_25 = arith.constant dense<0.000000e+00> : vector<64x128xf32>
    %36 = tpu.matmul %33, %35, %cst_25 {dimension_numbers = #tpu.dot_dimension_numbers<[1], [0], [0], [1], [0, 0, 1, 1], [], []>} : vector<64x8xbf16>, vector<8x128xbf16>, vector<64x128xf32> -> vector<64x128xf32>
    %37 = arith.addf %28, %36 : vector<64x128xf32>
    %c1_i32_26 = arith.constant 1 : i32
    %38 = arith.addi %0, %c1_i32_26 : i32
    %c0_27 = arith.constant 0 : index
    %39 = arith.index_cast %38 : i32 to index
    %c1_28 = arith.constant 1 : index
    %c0_29 = arith.constant 0 : index
    %40 = vector.load %arg3[%c0_27, %39, %c1_28, %c0_29] : memref<1x18x18x8xbf16, #tpu.memory_space<vmem>>, vector<1x4x16x8xbf16>
    %41 = vector.shape_cast %40 : vector<1x4x16x8xbf16> to vector<4x16x8xbf16>
    %42 = vector.shape_cast %41 : vector<4x16x8xbf16> to vector<64x8xbf16>
    %c4 = arith.constant 4 : index
    %c0_30 = arith.constant 0 : index
    %c0_31 = arith.constant 0 : index
    %43 = vector.load %arg4[%c4, %c0_30, %c0_31] : memref<9x8x128xbf16, #tpu.memory_space<vmem>>, vector<1x8x128xbf16>
    %44 = vector.shape_cast %43 : vector<1x8x128xbf16> to vector<8x128xbf16>
    %cst_32 = arith.constant dense<0.000000e+00> : vector<64x128xf32>
    %45 = tpu.matmul %42, %44, %cst_32 {dimension_numbers = #tpu.dot_dimension_numbers<[1], [0], [0], [1], [0, 0, 1, 1], [], []>} : vector<64x8xbf16>, vector<8x128xbf16>, vector<64x128xf32> -> vector<64x128xf32>
    %46 = arith.addf %37, %45 : vector<64x128xf32>
    %c1_i32_33 = arith.constant 1 : i32
    %47 = arith.addi %0, %c1_i32_33 : i32
    %c0_34 = arith.constant 0 : index
    %48 = arith.index_cast %47 : i32 to index
    %c2_35 = arith.constant 2 : index
    %c0_36 = arith.constant 0 : index
    %49 = vector.load %arg3[%c0_34, %48, %c2_35, %c0_36] : memref<1x18x18x8xbf16, #tpu.memory_space<vmem>>, vector<1x4x16x8xbf16>
    %50 = vector.shape_cast %49 : vector<1x4x16x8xbf16> to vector<4x16x8xbf16>
    %51 = vector.shape_cast %50 : vector<4x16x8xbf16> to vector<64x8xbf16>
    %c5 = arith.constant 5 : index
    %c0_37 = arith.constant 0 : index
    %c0_38 = arith.constant 0 : index
    %52 = vector.load %arg4[%c5, %c0_37, %c0_38] : memref<9x8x128xbf16, #tpu.memory_space<vmem>>, vector<1x8x128xbf16>
    %53 = vector.shape_cast %52 : vector<1x8x128xbf16> to vector<8x128xbf16>
    %cst_39 = arith.constant dense<0.000000e+00> : vector<64x128xf32>
    %54 = tpu.matmul %51, %53, %cst_39 {dimension_numbers = #tpu.dot_dimension_numbers<[1], [0], [0], [1], [0, 0, 1, 1], [], []>} : vector<64x8xbf16>, vector<8x128xbf16>, vector<64x128xf32> -> vector<64x128xf32>
    %55 = arith.addf %46, %54 : vector<64x128xf32>
    %c2_i32 = arith.constant 2 : i32
    %56 = arith.addi %0, %c2_i32 : i32
    %c0_40 = arith.constant 0 : index
    %57 = arith.index_cast %56 : i32 to index
    %c0_41 = arith.constant 0 : index
    %c0_42 = arith.constant 0 : index
    %58 = vector.load %arg3[%c0_40, %57, %c0_41, %c0_42] : memref<1x18x18x8xbf16, #tpu.memory_space<vmem>>, vector<1x4x16x8xbf16>
    %59 = vector.shape_cast %58 : vector<1x4x16x8xbf16> to vector<4x16x8xbf16>
    %60 = vector.shape_cast %59 : vector<4x16x8xbf16> to vector<64x8xbf16>
    %c6 = arith.constant 6 : index
    %c0_43 = arith.constant 0 : index
    %c0_44 = arith.constant 0 : index
    %61 = vector.load %arg4[%c6, %c0_43, %c0_44] : memref<9x8x128xbf16, #tpu.memory_space<vmem>>, vector<1x8x128xbf16>
    %62 = vector.shape_cast %61 : vector<1x8x128xbf16> to vector<8x128xbf16>
    %cst_45 = arith.constant dense<0.000000e+00> : vector<64x128xf32>
    %63 = tpu.matmul %60, %62, %cst_45 {dimension_numbers = #tpu.dot_dimension_numbers<[1], [0], [0], [1], [0, 0, 1, 1], [], []>} : vector<64x8xbf16>, vector<8x128xbf16>, vector<64x128xf32> -> vector<64x128xf32>
    %64 = arith.addf %55, %63 : vector<64x128xf32>
    %c2_i32_46 = arith.constant 2 : i32
    %65 = arith.addi %0, %c2_i32_46 : i32
    %c0_47 = arith.constant 0 : index
    %66 = arith.index_cast %65 : i32 to index
    %c1_48 = arith.constant 1 : index
    %c0_49 = arith.constant 0 : index
    %67 = vector.load %arg3[%c0_47, %66, %c1_48, %c0_49] : memref<1x18x18x8xbf16, #tpu.memory_space<vmem>>, vector<1x4x16x8xbf16>
    %68 = vector.shape_cast %67 : vector<1x4x16x8xbf16> to vector<4x16x8xbf16>
    %69 = vector.shape_cast %68 : vector<4x16x8xbf16> to vector<64x8xbf16>
    %c7 = arith.constant 7 : index
    %c0_50 = arith.constant 0 : index
    %c0_51 = arith.constant 0 : index
    %70 = vector.load %arg4[%c7, %c0_50, %c0_51] : memref<9x8x128xbf16, #tpu.memory_space<vmem>>, vector<1x8x128xbf16>
    %71 = vector.shape_cast %70 : vector<1x8x128xbf16> to vector<8x128xbf16>
    %cst_52 = arith.constant dense<0.000000e+00> : vector<64x128xf32>
    %72 = tpu.matmul %69, %71, %cst_52 {dimension_numbers = #tpu.dot_dimension_numbers<[1], [0], [0], [1], [0, 0, 1, 1], [], []>} : vector<64x8xbf16>, vector<8x128xbf16>, vector<64x128xf32> -> vector<64x128xf32>
    %73 = arith.addf %64, %72 : vector<64x128xf32>
    %c2_i32_53 = arith.constant 2 : i32
    %74 = arith.addi %0, %c2_i32_53 : i32
    %c0_54 = arith.constant 0 : index
    %75 = arith.index_cast %74 : i32 to index
    %c2_55 = arith.constant 2 : index
    %c0_56 = arith.constant 0 : index
    %76 = vector.load %arg3[%c0_54, %75, %c2_55, %c0_56] : memref<1x18x18x8xbf16, #tpu.memory_space<vmem>>, vector<1x4x16x8xbf16>
    %77 = vector.shape_cast %76 : vector<1x4x16x8xbf16> to vector<4x16x8xbf16>
    %78 = vector.shape_cast %77 : vector<4x16x8xbf16> to vector<64x8xbf16>
    %c8 = arith.constant 8 : index
    %c0_57 = arith.constant 0 : index
    %c0_58 = arith.constant 0 : index
    %79 = vector.load %arg4[%c8, %c0_57, %c0_58] : memref<9x8x128xbf16, #tpu.memory_space<vmem>>, vector<1x8x128xbf16>
    %80 = vector.shape_cast %79 : vector<1x8x128xbf16> to vector<8x128xbf16>
    %cst_59 = arith.constant dense<0.000000e+00> : vector<64x128xf32>
    %81 = tpu.matmul %78, %80, %cst_59 {dimension_numbers = #tpu.dot_dimension_numbers<[1], [0], [0], [1], [0, 0, 1, 1], [], []>} : vector<64x8xbf16>, vector<8x128xbf16>, vector<64x128xf32> -> vector<64x128xf32>
    %82 = arith.addf %73, %81 : vector<64x128xf32>
    %c0_60 = arith.constant 0 : index
    %c0_61 = arith.constant 0 : index
    %83 = vector.load %arg5[%c0_60, %c0_61] : memref<1x128xf32, #tpu.memory_space<vmem>>, vector<1x128xf32>
    %84 = vector.broadcast %83 : vector<1x128xf32> to vector<64x128xf32>
    %85 = arith.addf %82, %84 : vector<64x128xf32>
    %cst_62 = arith.constant 0.000000e+00 : f32
    %86 = vector.broadcast %cst_62 : f32 to vector<64x128xf32>
    %87 = arith.maximumf %85, %86 : vector<64x128xf32>
    %88 = vector.shape_cast %87 : vector<64x128xf32> to vector<1x4x16x128xf32>
    %c0_63 = arith.constant 0 : index
    %c0_64 = arith.constant 0 : index
    %c0_65 = arith.constant 0 : index
    %c0_66 = arith.constant 0 : index
    %89 = vector.load %arg6[%c0_63, %c0_64, %c0_65, %c0_66] : memref<1x4x16x128xf32, #tpu.memory_space<vmem>>, vector<1x4x16x128xf32>
    tpu.vector_store %arg6[%c0_63, %c0_64, %c0_65, %c0_66], %88 {strides = array<i32>} : memref<1x4x16x128xf32, #tpu.memory_space<vmem>>, vector<1x4x16x128xf32>,
    return
  }
  func.func @transform_0(%arg0: i32, %arg1: i32, %arg2: i32) -> (i32, i32, i32, i32) {
    %c0_i32 = arith.constant 0 : i32
    %c0_i32_0 = arith.constant 0 : i32
    %c0_i32_1 = arith.constant 0 : i32
    %c0_i32_2 = arith.constant 0 : i32
    return %arg0, %c0_i32, %c0_i32_0, %c0_i32_1 : i32, i32, i32, i32
  }
  func.func @transform_1(%arg0: i32, %arg1: i32, %arg2: i32) -> (i32, i32, i32) {
    %c0_i32 = arith.constant 0 : i32
    %c0_i32_0 = arith.constant 0 : i32
    %c0_i32_1 = arith.constant 0 : i32
    return %c0_i32, %c0_i32_0, %arg1 : i32, i32, i32
  }
  func.func @transform_2(%arg0: i32, %arg1: i32, %arg2: i32) -> (i32, i32) {
    %c0_i32 = arith.constant 0 : i32
    %c0_i32_0 = arith.constant 0 : i32
    return %c0_i32, %arg1 : i32, i32
  }
  func.func @transform_3(%arg0: i32, %arg1: i32, %arg2: i32) -> (i32, i32, i32, i32) {
    %c0_i32 = arith.constant 0 : i32
    %c0_i32_0 = arith.constant 0 : i32
    return %arg0, %arg2, %c0_i32, %arg1 : i32, i32, i32, i32
  }
}

</mosaic_0001>

<bundles_post_ra>
// kernel: conv_bn_act_forward.1
= control target key start
LH: loop header
LB: loop body
LE: loop exit
PB: predicated region body
PF: predicated region fallthrough
CT: control target
= control target key end

     0   :  { %s1791_s12 = smov 0   ;;  %s1793_s13 = smov 0   ;;  %s2267_s0 = inlined_call_operand.vmem [shape: bf16[2,18,18,8], index: 0, kind: input, shape index: {}]   ;;  %s2268_s1 = inlined_call_operand.vmem [shape: bf16[9,8,128], index: 1, kind: input, shape index: {}]   ;;  %s2269_s2 = inlined_call_operand.vmem [shape: f32[1,128], index: 2, kind: input, shape index: {}]   ;;  %s2270_s3 = inlined_call_operand.vmem [shape: f32[2,16,16,128], index: 3, kind: output, shape index: {}]  }
   0x1   :  { %s1795_s14 = smov 0   ;;  %s1797_s15 = smov 0  }
   0x2   :  { %s1799_s16 = smov 0  }
   0x3 LB: > { %s25_s17 = sadd.s32 1, %s1761_s14  ;;  %s32_s18 = sadd.s32 1, %s1765_s15  ;;  %s1769_s16 = sphi %s1799_s16, %s13_s16   ;;  %s1765_s15 = sphi %s1797_s15, %s2278_s15   ;;  %s1761_s14 = sphi %s1795_s14, %s2277_s14   ;;  %s1757_s13 = sphi %s1793_s13, %s2276_s13   ;;  %s1753_s12 = sphi %s1791_s12, %s2275_s12  }
   0x4   : > { %p26_p0 = scmp.ge.s32.totalorder %s25_s17, 4  ;;  %p1506_p1 = scmp.ge.s32.totalorder %s1769_s16, 1 }
   0x5   : > { %p177_p2 = scmp.lt.s32.totalorder %s1769_s16, 9 }
   0x6   : > { %s2280_s17 = smov (%p26_p0, %s25_s17), 0  ;;  %s2282_s18 = smov (!%p26_p0, %s32_s18), %s1765_s15 }
   0x7   : > { %p178_p3 = pnand %p1506_p1, %p177_p2  ;;  %p34_p4 = scmp.ge.s32.totalorder %s2282_s18, 2 }
   0x8   : > { %p216_p5 = scmp.lt.s32.totalorder (!%p178_p3), %s1757_s13, 1  ;;  %s1673_s23 = smul.u32 (!%p178_p3), 48, %s1753_s12 }
   0x9   : > { %s2284_s18 = smov (%p34_p4, %s2282_s18), 0  ;;  %181 = sbr.rel (%p178_p3) target bundleno = 318 (0x13e), region = 32 }
   0xe   : > { %v1515_v0 = vld [vmem:[%s2268_s1 + $0x4] sm:$0xf]  ;;  %vm386_vm0 = vcmask 1043456   ;;  %s2286_s13 = smov (!%p216_p5, %s1757_s13), 1  ;;  %v1544_v2 = vld [vmem:[%s2268_s1 + $0x8] sm:$0xf] }
   0xf   : > { %v388_v1 = vsel %vm386_vm0, %v1515_v0, 0  ;;  %v553_v3 = vsel %vm386_vm0, %v1544_v2, 0  ;;  %s1689_s24 = smul.u32 216, %s2286_s13  ;;  %v1559_v4 = vld [vmem:[%s2268_s1 + $0xc] sm:$0xf]  ;;  %vm373_vm3 = vcmask 64512  }
  0x10   : > { %1686 = vmatpush.bf16.msra.mxu1 %v388_v1  ;;  %1687 = vmatpush.bf16.msra.mxu2 %v388_v1  ;;  %v255_v5 = vld [vmem:[%s2268_s1] sm:$0xf]  ;;  %v639_v6 = vsel %vm386_vm0, %v1559_v4, 0  ;;  %v1592_v8 = vld [vmem:[%s2268_s1 + $0x10] sm:$0xf]  ;;  %vm495_vm5 = vcmask 1042432  }
  0x11   : > { %1688 = vmatpush.bf16.msra.mxu3 %v388_v1  ;;  %397 = vmatpush.bf16.msra.mxu0 %v388_v1  ;;  %v452_v7 = vsel %vm386_vm0, %v255_v5, 0  ;;  %s220_s6 = scalar_lea.vmem %s2267_s0, %s1689_s24  ;;  %v813_v9 = vsel %vm386_vm0, %v1592_v8, 0  ;;  %vm260_vm1 = vsmask.f32 3328  ;;  %vm261_vm2 = vsmask.f32 7440 }
  0x12   : > { %s1850_s7 = scalar_lea.vmem %s220_s6, %s1673_s23  ;;  %vm1878_vm4 = vmor %vm260_vm1, %vm261_vm2  ;;  %vm496_vm6 = vcmask 1046532   ;;  %s1508_s23 = sshll.u32 %s1753_s12, 2 }
  0x13   : > { %v249_v10 = vld [vmem:[%s1850_s7 + $0xc] sm:$0xf]  ;;  %v1854_v11 = vld [vmem:[%s1850_s7 + $0x10] sm:$0xf]  ;;  %v1857_v12 = vld [vmem:[%s1850_s7 + $0x14] sm:$0x1] }
  0x14   : > { %562 = vmatpush.bf16.msrb.mxu2 %v553_v3  ;;  %461 = vmatpush.bf16.msrb.mxu1 %v452_v7  ;;  %v288_v13 = vshrl.u32 %v249_v10, 16  ;;  %v291_v14 = vshll.u32 %v249_v10, 16  ;;  %v297_v15 = vshll.u32 %v1854_v11, 16  ;;  %v301_v16 = vshrl.u32 %v1854_v11, 16  ;;  %v251_v17 = vld [vmem:[%s1850_s7 + $0x18] sm:$0xf]  ;;  %vm1912_vm7 = vmor %vm495_vm5, %vm496_vm6 }
  0x15   : > { %648 = vmatpush.bf16.msrb.mxu3 %v639_v6  ;;  %822 = vmatpush.bf16.msrb.mxu0 %v813_v9  ;;  %v307_v18 = vshll.u32 %v1857_v12, 16  ;;  %v1864_v19 = vld [vmem:[%s1850_s7 + $0x1c] sm:$0xf]  ;;  %v1867_v20 = vld [vmem:[%s1850_s7 + $0x20] sm:$0x1]  ;;  %v312_v21 = vshrl.u32 %v251_v17, 16 }
  0x16   : > { %v290_v22 = vrot.slane %v288_v13, 4  ;;  %v293_v23 = vrot.slane %v291_v14, 5  ;;  %v299_v24 = vrot.slane %v297_v15, 5  ;;  %v303_v25 = vrot.slane %v301_v16, 4  ;;  %v253_v26 = vld [vmem:[%s1850_s7 + $0x24] sm:$0xf] }
  0x17   : > { %v309_v27 = vrot.slane %v307_v18, 5  ;;  %v314_v28 = vrot.slane %v312_v21, 4  ;;  %v315_v29 = vshll.u32 %v251_v17, 16  ;;  %v321_v30 = vshll.u32 %v1864_v19, 16  ;;  %v1874_v35 = vld [vmem:[%s1850_s7 + $0x28] sm:$0xf] }
  0x18   : > { %v294_v31 = vor.u32 %v293_v23, %v290_v22  ;;  %v304_v32 = vor.u32 %v303_v25, %v299_v24  ;;  %v325_v33 = vshrl.u32 %v1864_v19, 16  ;;  %v331_v34 = vshll.u32 %v1867_v20, 16  ;;  %v1883_v46 = vld [vmem:[%s1850_s7 + $0x2c] sm:$0x1]  ;;  %v247_v54 = vld [vmem:[%s1850_s7] sm:$0xf] }
  0x19   : > { %v317_v37 = vrot.slane %v315_v29, 5  ;;  %v323_v38 = vrot.slane %v321_v30, 5  ;;  %v336_v39 = vshrl.u32 %v253_v26, 16  ;;  %v339_v40 = vshll.u32 %v253_v26, 16  ;;  %v248_v2 = vld [vmem:[%s1850_s7 + $0x4] sm:$0xf] }
  0x1a   : > { %v295_v41 = vrot.slane %v294_v31, 4  ;;  %v305_v42 = vrot.slane %v304_v32, 4  ;;  %v327_v43 = vrot.slane %v325_v33, 4  ;;  %v333_v44 = vrot.slane %v331_v34, 5  ;;  %v256_v8 = vld [vmem:[%s1850_s7 + $0x8] sm:$0x1] }
  0x1b   : > { %v318_v45 = vor.u32 %v317_v37, %v314_v28  ;;  %v338_v47 = vrot.slane %v336_v39, 4  ;;  %v341_v48 = vrot.slane %v339_v40, 5  ;;  %v345_v49 = vshll.u32 %v1874_v35, 16  ;;  %v483_v15 = vld [vmem:[%s1850_s7] sm:$0xe]  ;;  %p231_p6 = scmp.lt.s32.totalorder %s1508_s23, 15 }
  0x1c   : > { %v300_v50 = vsel %vm1878_vm4, %v295_v41, %v299_v24  ;;  %v310_v51 = vsel %vm1878_vm4, %v305_v42, %v309_v27  ;;  %v328_v52 = vor.u32 %v327_v43, %v323_v38  ;;  %v349_v53 = vshrl.u32 %v1874_v35, 16  ;;  %v1620_v22 = vld [vmem:[%s2268_s1 + $0x18] sm:$0xf]  ;;  %v1580_v27 = vld [vmem:[%s1850_s7 + $0xc] sm:$0xf]  ;;  %s1510_s12 = sshll.u32 %s2286_s13, 5 }
  0x1d   : > { %v363_v55 = vunpack.c.l.b16 %v300_v50  ;;  %v364_v56 = vunpack.c.l.b16 %v310_v51  ;;  %v319_v57 = vrot.slane %v318_v45, 4  ;;  %v342_v58 = vor.u32 %v341_v48, %v338_v47  ;;  %v1918_v41 = vld [vmem:[%s1850_s7 + $0x10] sm:$0xf]  ;;  %s2288_s23 = smov (!%p231_p6, %s1508_s23), 15 }
  0x1e   : > { %v329_v59 = vrot.slane %v328_v52, 4  ;;  %v347_v60 = vrot.slane %v345_v49, 5  ;;  %v351_v61 = vrot.slane %v349_v53, 4  ;;  %v355_v62 = vshll.u32 %v1883_v46, 16  ;;  %v1926_v53 = vld [vmem:[%s1850_s7 + $0x14] sm:$0x1] }
  0x1f   : > { %v370_v63 = vpack.c.b16 %v364_v56, %v363_v55  ;;  %v324_v0 = vsel %vm1878_vm4, %v319_v57, %v323_v38  ;;  %v343_v1 = vrot.slane %v342_v58, 4  ;;  %v264_v3 = vshrl.u32 %v247_v54, 16  ;;  %v1653_v56 = vld [vmem:[%s2268_s1 + $0x1c] sm:$0xf]  ;;  %s1509_s24 = sshll.u32 %s2288_s23, 1 }
  0x20   : > { %v334_v4 = vsel %vm1878_vm4, %v329_v59, %v333_v44  ;;  %v365_v5 = vunpack.c.l.b16 %v324_v0  ;;  %v352_v6 = vor.u32 %v351_v61, %v347_v60  ;;  %v357_v7 = vrot.slane %v355_v62, 5  ;;  %s238_s25 = sadd.s32 %s1510_s12, %s1509_s24 }
  0x21   : > { %1517 = vmatmul.msk.bf16.vlgmr.msra.gmra.mxu1 %vm373_vm3, %v370_v63  ;;  %v366_v9 = vunpack.c.l.b16 %v334_v4  ;;  %v348_v10 = vsel %vm1878_vm4, %v343_v1, %v347_v60  ;;  %v266_v13 = vrot.slane %v264_v3, 4  ;;  %v267_v14 = vshll.u32 %v247_v54, 16  ;;  %v1605_v60 = vld [vmem:[%s2268_s1 + $0x14] sm:$0xf]  ;;  %v1666_v1 = vld [vmem:[%s2268_s1 + $0x20] sm:$0xf] }
  0x22   : > { %v353_v16 = vrot.slane %v352_v6, 4  ;;  %v367_v17 = vunpack.c.l.b16 %v348_v10  ;;  %v273_v18 = vshll.u32 %v248_v2, 16  ;;  %v277_v21 = vshrl.u32 %v248_v2, 16  ;;  %v1674_v6 = vld [vmem:[%s1850_s7] sm:$0xff]  ;;  %s1511_s28 = sshll.u32 %s238_s25, 3 }
  0x23   : > { %v371_v23 = vpack.c.b16 %v366_v9, %v365_v5  ;;  %v269_v24 = vrot.slane %v267_v14, 5  ;;  %v283_v25 = vshll.u32 %v256_v8, 16  ;;  %v503_v26 = vrot.slane %v256_v8, 5  ;;  %s2213_s30 = scalar_lea.vmem %s2270_s3, %s1511_s28 }
  0x24   : > { %v358_v28 = vsel %vm1878_vm4, %v353_v16, %v357_v7  ;;  %v275_v29 = vrot.slane %v273_v18, 5  ;;  %v279_v30 = vrot.slane %v277_v21, 4  ;;  %v1540_v31 = vrot.slane %v483_v15, 9  ;;  %v1583_v16 = vld [vmem:[%s1850_s7 + $0x18] sm:$0xf] }
  0x25   : > { %1518 = vmatmul.msk.bf16.vlgmr.msra.gmra.mxu2 %vm373_vm3, %v371_v23  ;;  %v368_v32 = vunpack.c.l.b16 %v358_v28  ;;  %v270_v33 = vor.u32 %v269_v24, %v266_v13  ;;  %v285_v34 = vrot.slane %v283_v25, 5  ;;  %v500_v37 = vrot.slane %v248_v2, 5  ;;  %v1952_v18 = vld [vmem:[%s1850_s7 + $0x1c] sm:$0xf]  ;;  %v484_v23 = vld [vmem:[%s1850_s7 + $0xc] sm:$0xe] }
  0x26   : > { %v280_v38 = vor.u32 %v279_v30, %v275_v29  ;;  %v1009_v40 = vsel %vm386_vm0, %v1620_v22, 0  ;;  %v691_v42 = vshrl.u32 %v1580_v27, 16  ;;  %v694_v43 = vshll.u32 %v1580_v27, 16 }
  0x27   : > { %v372_v44 = vpack.c.b16 %v368_v32, %v367_v17  ;;  %v271_v45 = vrot.slane %v270_v33, 4  ;;  %v502_v47 = vrot.slane %v500_v37, 4  ;;  %1018 = vmatpush.bf16.msra.mxu2 %v1009_v40  ;;  %v501_v52 = vsel %vm1912_vm7, %v1540_v31, %v500_v37 }
  0x28   : > { %v281_v48 = vrot.slane %v280_v38, 4  ;;  %v693_v49 = vrot.slane %v691_v42, 4  ;;  %v696_v50 = vrot.slane %v694_v43, 5  ;;  %v700_v54 = vshll.u32 %v1918_v41, 16  ;;  %v1967_v42 = vld [vmem:[%s1850_s7 + $0x20] sm:$0x1] }
  0x29   : > { %1519 = vmatmul.msk.bf16.vlgmr.msra.gmra.mxu3 %vm373_vm3, %v372_v44  ;;  %v276_v51 = vsel %vm1878_vm4, %v271_v45, %v275_v29  ;;  %v704_v55 = vshrl.u32 %v1918_v41, 16  ;;  %v504_v59 = vsel %vm1912_vm7, %v502_v47, %v503_v26  ;;  %v528_v2 = vunpack.c.l.b16 %v501_v52  ;;  %v1678_v29 = vld [vmem:[%s1850_s7 + $0xc] sm:$0xff]  ;;  %v1586_v52 = vld [vmem:[%s1850_s7 + $0x24] sm:$0xf] }
  0x2a   : > { %v286_v57 = vsel %vm1878_vm4, %v281_v48, %v285_v34  ;;  %v361_v58 = vunpack.c.l.b16 %v276_v51  ;;  %v697_v62 = vor.u32 %v696_v50, %v693_v49  ;;  %v702_v63 = vrot.slane %v700_v54, 5  ;;  %v1675_v49 = vld [vmem:[%s1850_s7 + $0xc] sm:$0xff] }
  0x2b   : > { %v362_v61 = vunpack.c.l.b16 %v286_v57  ;;  %v706_v0 = vrot.slane %v704_v55, 4  ;;  %v710_v3 = vshll.u32 %v1926_v53, 16  ;;  %v1183_v4 = vsel %vm386_vm0, %v1653_v56, 0  ;;  %v1978_v57 = vld [vmem:[%s1850_s7 + $0x28] sm:$0xf] }
  0x2c   : > { %v529_v7 = vunpack.c.l.b16 %v504_v59  ;;  %1192 = vmatpush.bf16.msra.mxu3 %v1183_v4  ;;  %v923_v9 = vsel %vm386_vm0, %v1605_v60, 0  ;;  %v1293_v10 = vsel %vm386_vm0, %v1666_v1, 0  ;;  %v698_v13 = vrot.slane %v697_v62, 4  ;;  %v485_v59 = vld [vmem:[%s1850_s7 + $0x18] sm:$0xe] }
  0x2d   : > { %v369_v5 = vpack.c.b16 %v362_v61, %v361_v58  ;;  %v707_v8 = vor.u32 %v706_v0, %v702_v63  ;;  %932 = vmatpush.bf16.msra.mxu1 %v923_v9  ;;  %v712_v15 = vrot.slane %v710_v3, 5  ;;  %v507_v21 = vrot.slane %v1854_v11, 5  ;;  %v1679_v3 = vld [vmem:[%s1850_s7 + $0x18] sm:$0xff] }
  0x2e   : > { %v536_v17 = vpack.c.b16 %v529_v7, %v528_v2  ;;  %v703_v22 = vsel %vm1878_vm4, %v698_v13, %v702_v63  ;;  %v715_v24 = vshrl.u32 %v1583_v16, 16  ;;  %v718_v26 = vshll.u32 %v1583_v16, 16 }
  0x2f   : > { %1516 = vmatmul.msk.bf16.vlgmr.msra.gmra.mxu0 %vm373_vm3, %v369_v5  ;;  %v708_v14 = vrot.slane %v707_v8, 4  ;;  %v724_v27 = vshll.u32 %v1952_v18, 16  ;;  %v728_v28 = vshrl.u32 %v1952_v18, 16  ;;  %v1541_v30 = vrot.slane %v484_v23, 9  ;;  %v1676_v23 = vld [vmem:[%s1850_s7 + $0x18] sm:$0xff] }
  0x30   : > { %1302 = vmatpush.bf16.msra.mxu0 %v1293_v10  ;;  %v509_v31 = vrot.slane %v507_v21, 4  ;;  %v510_v11 = vrot.slane %v1857_v12, 5  ;;  %v788_v32 = vunpack.c.l.b16 %v703_v22  ;;  %v717_v34 = vrot.slane %v715_v24, 4 }
  0x31   : > { %1536 = vmatmul.msk.bf16.vlgmr.msrb.gmra.mxu1 %vm373_vm3, %v1674_v6  ;;  %v713_v25 = vsel %vm1878_vm4, %v708_v14, %v712_v15  ;;  %v720_v37 = vrot.slane %v718_v26, 5  ;;  %v726_v38 = vrot.slane %v724_v27, 5  ;;  %v730_v40 = vrot.slane %v728_v28, 4  ;;  %v1993_v14 = vld [vmem:[%s1850_s7 + $0x2c] sm:$0x1] }
  0x32   : > { %v789_v33 = vunpack.c.l.b16 %v713_v25  ;;  %v508_v43 = vsel %vm1912_vm7, %v1541_v30, %v507_v21  ;;  %v511_v44 = vsel %vm1912_vm7, %v509_v31, %v510_v11  ;;  %v734_v48 = vshll.u32 %v1967_v42, 16  ;;  %v1589_v30 = vld [vmem:[%s1850_s7 + $0x30] sm:$0xf]  ;;  %v486_v11 = vld [vmem:[%s1850_s7 + $0x24] sm:$0xe] }
  0x33   : > { %v721_v45 = vor.u32 %v720_v37, %v717_v34  ;;  %v731_v47 = vor.u32 %v730_v40, %v726_v38  ;;  %v530_v50 = vunpack.c.l.b16 %v508_v43  ;;  %v531_v51 = vunpack.c.l.b16 %v511_v44 }
  0x34   : > { %v796_v12 = vpack.c.b16 %v789_v33, %v788_v32  ;;  %v736_v56 = vrot.slane %v734_v48, 5  ;;  %v514_v60 = vrot.slane %v1864_v19, 5  ;;  %v739_v61 = vshrl.u32 %v1586_v52, 16  ;;  %v2008_v32 = vld [vmem:[%s1850_s7 + $0x34] sm:$0xf] }
  0x35   : > { %1545 = vmatmul.msk.bf16.vlgmr.msrb.gmra.mxu2 %vm373_vm3, %v536_v17  ;;  %v722_v54 = vrot.slane %v721_v45, 4  ;;  %v732_v55 = vrot.slane %v731_v47, 4  ;;  %v537_v58 = vpack.c.b16 %v531_v51, %v530_v50  ;;  %v742_v62 = vshll.u32 %v1586_v52, 16  ;;  %v1680_v45 = vld [vmem:[%s1850_s7 + $0x24] sm:$0xff] }
  0x36   : > { %v748_v63 = vshll.u32 %v1978_v57, 16  ;;  %v752_v0 = vshrl.u32 %v1978_v57, 16  ;;  %v1542_v4 = vrot.slane %v485_v59, 9  ;;  %v516_v5 = vrot.slane %v514_v60, 4 }
  0x37   : > { %v727_v1 = vsel %vm1878_vm4, %v722_v54, %v726_v38  ;;  %v737_v2 = vsel %vm1878_vm4, %v732_v55, %v736_v56  ;;  %v517_v19 = vrot.slane %v1867_v20, 5  ;;  %v741_v6 = vrot.slane %v739_v61, 4  ;;  %v2025_v55 = vld [vmem:[%s1850_s7 + $0x38] sm:$0x1] }
  0x38   : > { %v744_v7 = vrot.slane %v742_v62, 5  ;;  %v790_v8 = vunpack.c.l.b16 %v727_v1  ;;  %v791_v9 = vunpack.c.l.b16 %v737_v2  ;;  %v750_v10 = vrot.slane %v748_v63, 5  ;;  %v1641_v56 = vld [vmem:[%s1850_s7 + $0x18] sm:$0xf] }
  0x39   : > { %1576 = vmatmul.msk.bf16.vlgmr.msrb.gmra.mxu3 %vm373_vm3, %v1678_v29  ;;  %v754_v13 = vrot.slane %v752_v0, 4  ;;  %v515_v15 = vsel %vm1912_vm7, %v1542_v4, %v514_v60  ;;  %v518_v16 = vsel %vm1912_vm7, %v516_v5, %v517_v19  ;;  %v758_v22 = vshll.u32 %v1993_v14, 16 }
  0x3a   : > { %v745_v17 = vor.u32 %v744_v7, %v741_v6  ;;  %v797_v20 = vpack.c.b16 %v791_v9, %v790_v8  ;;  %v532_v24 = vunpack.c.l.b16 %v515_v15  ;;  %v533_v25 = vunpack.c.l.b16 %v518_v16  ;;  %v1597_v6 = vld [vmem:[%s1850_s7 + $0xc] sm:$0xe] }
  0x3b   : > { %v755_v21 = vor.u32 %v754_v13, %v750_v10  ;;  %v760_v28 = vrot.slane %v758_v22, 5  ;;  %v521_v29 = vrot.slane %v1874_v35, 5  ;;  %v524_v37 = vrot.slane %v1883_v46, 5  ;;  %v1643_v22 = vld [vmem:[%s1850_s7 + $0x20] sm:$0x1] }
  0x3c   : > { %v746_v26 = vrot.slane %v745_v17, 4  ;;  %v538_v31 = vpack.c.b16 %v533_v25, %v532_v24  ;;  %v763_v38 = vshrl.u32 %v1589_v30, 16  ;;  %v766_v40 = vshll.u32 %v1589_v30, 16  ;;  %v1681_v25 = vld [vmem:[%s1850_s7 + $0x30] sm:$0xff] }
  0x3d   : > { %v756_v27 = vrot.slane %v755_v21, 4  ;;  %v1543_v35 = vrot.slane %v486_v11, 9  ;;  %v523_v43 = vrot.slane %v521_v29, 4  ;;  %v772_v44 = vshll.u32 %v2008_v32, 16 }
  0x3e   : > { %v751_v33 = vsel %vm1878_vm4, %v746_v26, %v750_v10  ;;  %v768_v50 = vrot.slane %v766_v40, 5  ;;  %v782_v0 = vshll.u32 %v2025_v55, 16  ;;  %v1061_v1 = vshrl.u32 %v1641_v56, 16  ;;  %v1644_v40 = vld [vmem:[%s1850_s7 + $0x24] sm:$0xf] }
  0x3f   : > { %1593 = vmatmul.msk.bf16.vlgmr.msrb.gmra.mxu0 %vm373_vm3, %v796_v12  ;;  %v761_v34 = vsel %vm1878_vm4, %v756_v27, %v760_v28  ;;  %v776_v12 = vshrl.u32 %v2008_v32, 16  ;;  %v792_v47 = vunpack.c.l.b16 %v751_v33  ;;  %v522_v46 = vsel %vm1912_vm7, %v1543_v35, %v521_v29  ;;  %v2054_v35 = vld [vmem:[%s1850_s7 + $0x28] sm:$0xf] }
  0x40   : > { %v793_v48 = vunpack.c.l.b16 %v761_v34  ;;  %v525_v51 = vsel %vm1912_vm7, %v523_v43, %v524_v37  ;;  %v774_v52 = vrot.slane %v772_v44, 5  ;;  %v534_v60 = vunpack.c.l.b16 %v522_v46 }
  0x41   : > { %1537 = vmatmul.msk.bf16.gmra.mxu1 %vm373_vm3, %v1675_v49  ;;  %v765_v49 = vrot.slane %v763_v38, 4  ;;  %v778_v54 = vrot.slane %v776_v12, 4  ;;  %v535_v61 = vunpack.c.l.b16 %v525_v51  ;;  %v1064_v2 = vshll.u32 %v1641_v56, 16 }
  0x42   : > { %v798_v59 = vpack.c.b16 %v793_v48, %v792_v47  ;;  %v870_v4 = vrot.slane %v1918_v41, 5  ;;  %v873_v7 = vrot.slane %v1926_v53, 5  ;;  %v784_v13 = vrot.slane %v782_v0, 5  ;;  %v1658_v47 = vld [vmem:[%s1850_s7 + $0x18] sm:$0xe] }
  0x43   : > { %v769_v62 = vor.u32 %v768_v50, %v765_v49  ;;  %v779_v63 = vor.u32 %v778_v54, %v774_v52  ;;  %v539_v8 = vpack.c.b16 %v535_v61, %v534_v60  ;;  %v1063_v15 = vrot.slane %v1061_v1, 4  ;;  %v1598_v54 = vld [vmem:[%s1850_s7 + $0x18] sm:$0xe] }
  0x44   : > { %v1066_v16 = vrot.slane %v1064_v2, 5  ;;  %v1601_v41 = vrot.slane %v1597_v6, 9  ;;  %v872_v17 = vrot.slane %v870_v4, 4  ;;  %v1080_v29 = vshll.u32 %v1643_v22, 16 }
  0x45   : > { %1546 = vmatmul.msk.bf16.gmra.mxu2 %vm373_vm3, %v537_v58  ;;  %v2029_v58 = vld [vmem:[%s1850_s7 + $0x1c] sm:$0xf]  ;;  %v770_v9 = vrot.slane %v769_v62, 4  ;;  %v780_v10 = vrot.slane %v779_v63, 4  ;;  %v1085_v48 = vshrl.u32 %v1644_v40, 16  ;;  %v1088_v49 = vshll.u32 %v1644_v40, 16 }
  0x46   : > { %v1070_v5 = vshll.u32 %v2029_v58, 16  ;;  %v1074_v19 = vshrl.u32 %v2029_v58, 16  ;;  %v1067_v24 = vor.u32 %v1066_v16, %v1063_v15  ;;  %v871_v26 = vsel %vm1912_vm7, %v1601_v41, %v870_v4 }
  0x47   : > { %v785_v53 = vsel %vm1878_vm4, %v780_v10, %v784_v13  ;;  %v874_v27 = vsel %vm1912_vm7, %v872_v17, %v873_v7  ;;  %v898_v11 = vunpack.c.l.b16 %v871_v26  ;;  %v1082_v38 = vrot.slane %v1080_v29, 5 }
  0x48   : > { %v1076_v21 = vrot.slane %v1074_v19, 4  ;;  %v899_v33 = vunpack.c.l.b16 %v874_v27  ;;  %v1068_v34 = vrot.slane %v1067_v24, 4  ;;  %v1240_v44 = vrot.slane %v2029_v58, 5 }
  0x49   : > { %1577 = vmatmul.msk.bf16.gmra.mxu3 %vm373_vm3, %v1679_v3  ;;  %v1677_v3 = vld [vmem:[%s1850_s7 + $0x24] sm:$0xff]  ;;  %v877_v46 = vrot.slane %v1952_v18, 5  ;;  %v1094_v51 = vshll.u32 %v2054_v35, 16  ;;  %v1662_v58 = vrot.slane %v1658_v47, 9  ;;  %v1243_v60 = vrot.slane %v1643_v22, 5  ;;  %v1682_v18 = vld [vmem:[%s1850_s7 + $0x18] sm:$0xff] }
  0x4a   : > { %v906_v12 = vpack.c.b16 %v899_v33, %v898_v11  ;;  %v880_v62 = vrot.slane %v1967_v42, 5  ;;  %v1087_v63 = vrot.slane %v1085_v48, 4  ;;  %v1090_v0 = vrot.slane %v1088_v49, 5  ;;  %v1599_v33 = vld [vmem:[%s1850_s7 + $0x24] sm:$0xe] }
  0x4b   : > { %v1602_v1 = vrot.slane %v1598_v54, 9  ;;  %v879_v2 = vrot.slane %v877_v46, 4  ;;  %v1241_v6 = vsel %vm1912_vm7, %v1662_v58, %v1240_v44  ;;  %v1247_v24 = vrot.slane %v2054_v35, 5 }
  0x4c   : > { %v1268_v15 = vunpack.c.l.b16 %v1241_v6 }
  0x4d   : > { %v878_v42 = vsel %vm1912_vm7, %v1602_v1, %v877_v46  ;;  %v1249_v40 = vrot.slane %v1247_v24, 4 }
  0x4e   : > { %v900_v41 = vunpack.c.l.b16 %v878_v42  ;;  %v1660_v42 = vld [vmem:[%s1850_s7 + $0x30] sm:$0xe] }
  0x4f   : > { %1594 = vmatmul.msk.bf16.gmra.mxu0 %vm373_vm3, %v797_v20  ;;  %v1072_v20 = vrot.slane %v1070_v5, 5  ;;  %v1646_v5 = vld [vmem:[%s1850_s7 + $0x2c] sm:$0x1] }
  0x50   : > { %v1104_v13 = vshll.u32 %v1646_v5, 16 }
  0x51   : > { %1538 = vmatmul.msk.bf16.gmra.mxu1 %vm373_vm3, %v1676_v23  ;;  %v775_v23 = vsel %vm1878_vm4, %v770_v9, %v774_v52  ;;  %v1077_v28 = vor.u32 %v1076_v21, %v1072_v20  ;;  %v1098_v52 = vshrl.u32 %v2054_v35, 16  ;;  %v881_v9 = vsel %vm1912_vm7, %v879_v2, %v880_v62 }
  0x52   : > { %v794_v30 = vunpack.c.l.b16 %v775_v23  ;;  %v901_v17 = vunpack.c.l.b16 %v881_v9  ;;  %v1106_v22 = vrot.slane %v1104_v13, 5  ;;  %v1647_v23 = vld [vmem:[%s1850_s7 + $0x30] sm:$0xf] }
  0x53   : > { %v1078_v37 = vrot.slane %v1077_v28, 4  ;;  %v1100_v4 = vrot.slane %v1098_v52, 4  ;;  %v1659_v28 = vld [vmem:[%s1850_s7 + $0x24] sm:$0xe]  ;;  %v1112_v11 = vshll.u32 %v1647_v23, 16 }
  0x54   : > { %v907_v26 = vpack.c.b16 %v901_v17, %v900_v41  ;;  %v1600_v17 = vld [vmem:[%s1850_s7 + $0x30] sm:$0xe] }
  0x55   : > { %1547 = vmatmul.msk.bf16.gmra.mxu2 %vm373_vm3, %v538_v31  ;;  %v795_v31 = vunpack.c.l.b16 %v785_v53  ;;  %v1083_v50 = vsel %vm1878_vm4, %v1078_v37, %v1082_v38  ;;  %v1663_v38 = vrot.slane %v1659_v28, 9  ;;  %v1114_v49 = vrot.slane %v1112_v11, 5 }
  0x56   : > { %v1159_v61 = vunpack.c.l.b16 %v1083_v50  ;;  %v1604_v28 = vrot.slane %v1600_v17, 9 }
  0x57   : > { %v799_v43 = vpack.c.b16 %v795_v31, %v794_v30  ;;  %v884_v30 = vrot.slane %v1978_v57, 5  ;;  %v1109_v31 = vshrl.u32 %v1647_v23, 16  ;;  %v1683_v57 = vld [vmem:[%s1850_s7 + $0x24] sm:$0xff]  ;;  %v1248_v52 = vsel %vm1912_vm7, %v1663_v38, %v1247_v24 }
  0x58   : > { %v1270_v62 = vunpack.c.l.b16 %v1248_v52 }
  0x59   : > { %1578 = vmatmul.msk.bf16.gmra.mxu3 %vm373_vm3, %v1680_v45  ;;  %v1073_v45 = vsel %vm1878_vm4, %v1068_v34, %v1072_v20  ;;  %v886_v47 = vrot.slane %v884_v30, 4  ;;  %v1111_v48 = vrot.slane %v1109_v31, 4  ;;  %v1652_v31 = vld [vmem:[%s1850_s7 + $0x44] sm:$0x1] }
  0x5a   : > { %v1158_v56 = vunpack.c.l.b16 %v1073_v45  ;;  %v1603_v45 = vrot.slane %v1599_v33, 9 }
  0x5c   : > { %v1166_v19 = vpack.c.b16 %v1159_v61, %v1158_v56  ;;  %v885_v56 = vsel %vm1912_vm7, %v1603_v45, %v884_v30 }
  0x5f   : > { %1595 = vmatmul.msk.bf16.gmra.mxu0 %vm373_vm3, %v798_v59  ;;  %v1242_v59 = vrot.slane %v1240_v44, 4  ;;  %v1250_v44 = vrot.slane %v1646_v5, 5  ;;  %v2112_v5 = vld [vmem:[%s1850_s7 + $0x40] sm:$0xf] }
  0x60   : > { %v1142_v13 = vshll.u32 %v2112_v5, 16  ;;  %v1146_v41 = vshrl.u32 %v2112_v5, 16 }
  0x61   : > { %1539 = vmatmul.msk.bf16.gmra.mxu1 %vm373_vm3, %v1677_v3  ;;  %v1096_v3 = vrot.slane %v1094_v51, 5  ;;  %v1244_v7 = vsel %vm1912_vm7, %v1242_v59, %v1243_v60  ;;  %v1649_v51 = vld [vmem:[%s1850_s7 + $0x38] sm:$0x1]  ;;  %v1251_v54 = vsel %vm1912_vm7, %v1249_v40, %v1250_v44  ;;  %v1115_v59 = vor.u32 %v1114_v49, %v1111_v48 }
  0x62   : > { %v1269_v16 = vunpack.c.l.b16 %v1244_v7  ;;  %v1128_v61 = vshll.u32 %v1649_v51, 16  ;;  %v1257_v23 = vrot.slane %v1649_v51, 5  ;;  %v1148_v30 = vrot.slane %v1146_v41, 4  ;;  %v1661_v51 = vld [vmem:[%s1850_s7 + $0x3c] sm:$0xe] }
  0x63   : > { %v1101_v10 = vor.u32 %v1100_v4, %v1096_v3  ;;  %v1116_v1 = vrot.slane %v1115_v59, 4  ;;  %v1650_v4 = vld [vmem:[%s1850_s7 + $0x3c] sm:$0xf]  ;;  %v1264_v59 = vrot.slane %v1652_v31, 5 }
  0x64   : > { %v1276_v53 = vpack.c.b16 %v1269_v16, %v1268_v15  ;;  %v1133_v9 = vshrl.u32 %v1650_v4, 16  ;;  %v891_v16 = vrot.slane %v2008_v32, 5  ;;  %v894_v32 = vrot.slane %v2025_v55, 5 }
  0x65   : > { %1548 = vmatmul.msk.bf16.gmra.mxu2 %vm373_vm3, %v539_v8  ;;  %v1091_v8 = vor.u32 %v1090_v0, %v1087_v63  ;;  %v1102_v21 = vrot.slane %v1101_v10, 4  ;;  %v1271_v63 = vunpack.c.l.b16 %v1251_v54  ;;  %v902_v0 = vunpack.c.l.b16 %v885_v56 }
  0x66   : > { %v1136_v10 = vshll.u32 %v1650_v4, 16  ;;  %v892_v38 = vsel %vm1912_vm7, %v1604_v28, %v891_v16  ;;  %v1665_v56 = vrot.slane %v1661_v51, 9 }
  0x67   : > { %v1092_v20 = vrot.slane %v1091_v8, 4  ;;  %v1107_v29 = vsel %vm1878_vm4, %v1102_v21, %v1106_v22  ;;  %v1664_v21 = vrot.slane %v1660_v42, 9 }
  0x69   : > { %1579 = vmatmul.msk.bf16.gmra.mxu3 %vm373_vm3, %v1681_v25  ;;  %v2084_v25 = vld [vmem:[%s1850_s7 + $0x34] sm:$0xf]  ;;  %v1097_v27 = vsel %vm1878_vm4, %v1092_v20, %v1096_v3  ;;  %v1130_v3 = vrot.slane %v1128_v61, 5 }
  0x6a   : > { %v1118_v34 = vshll.u32 %v2084_v25, 16  ;;  %v1122_v37 = vshrl.u32 %v2084_v25, 16  ;;  %v1160_v35 = vunpack.c.l.b16 %v1097_v27  ;;  %v1254_v7 = vrot.slane %v2084_v25, 5 }
  0x6b   : > { %v1135_v25 = vrot.slane %v1133_v9, 4  ;;  %v1144_v27 = vrot.slane %v1142_v13, 5 }
  0x6c   : > { %v1120_v50 = vrot.slane %v1118_v34, 5  ;;  %v1124_v46 = vrot.slane %v1122_v37, 4  ;;  %v1256_v22 = vrot.slane %v1254_v7, 4  ;;  %v1255_v11 = vsel %vm1912_vm7, %v1664_v21, %v1254_v7 }
  0x6d   : > { %v1149_v55 = vor.u32 %v1148_v30, %v1144_v27 }
  0x6e   : > { %v1125_v60 = vor.u32 %v1124_v46, %v1120_v50  ;;  %v1121_v8 = vsel %vm1878_vm4, %v1116_v1, %v1120_v50  ;;  %v1258_v33 = vsel %vm1912_vm7, %v1256_v22, %v1257_v23  ;;  %v1261_v50 = vrot.slane %v2112_v5, 5 }
  0x6f   : > { %1596 = vmatmul.msk.bf16.gmra.mxu0 %vm373_vm3, %v799_v43  ;;  %v1161_v43 = vunpack.c.l.b16 %v1107_v29  ;;  %v1162_v20 = vunpack.c.l.b16 %v1121_v8  ;;  %v893_v29 = vrot.slane %v891_v16, 4  ;;  %v1273_v44 = vunpack.c.l.b16 %v1258_v33 }
  0x70   : > { %v1126_v2 = vrot.slane %v1125_v60, 4  ;;  %v1685_v60 = vld [vmem:[%s1850_s7 + $0x3c] sm:$0xff] }
  0x71   : > { %1606 = vmatmul.msk.bf16.vlgmr.msra.gmra.mxu1 %vm373_vm3, %v906_v12  ;;  %v887_v12 = vrot.slane %v1993_v14, 5  ;;  %v1167_v14 = vpack.c.b16 %v1161_v43, %v1160_v35  ;;  %v895_v40 = vsel %vm1912_vm7, %v893_v29, %v894_v32  ;;  %v1152_v35 = vshll.u32 %v1652_v31, 16 }
  0x72   : > { %v1131_v15 = vsel %vm1878_vm4, %v1126_v2, %v1130_v3  ;;  %v1272_v43 = vunpack.c.l.b16 %v1255_v11 }
  0x73   : > { %v888_v58 = vsel %vm1912_vm7, %v886_v47, %v887_v12  ;;  %v1163_v24 = vunpack.c.l.b16 %v1131_v15  ;;  %v904_v12 = vunpack.c.l.b16 %v892_v38  ;;  %v1150_v47 = vrot.slane %v1149_v55, 4 }
  0x74   : > { %v1154_v48 = vrot.slane %v1152_v35, 5  ;;  %v1278_v49 = vpack.c.b16 %v1273_v44, %v1272_v43 }
  0x75   : > { %1637 = vmatmul.msk.bf16.vlgmr.msra.gmra.mxu2 %vm373_vm3, %v1682_v18  ;;  %v903_v18 = vunpack.c.l.b16 %v888_v58  ;;  %v1168_v34 = vpack.c.b16 %v1163_v24, %v1162_v20  ;;  %v1263_v58 = vrot.slane %v1261_v50, 4 }
  0x77   : > { %v908_v6 = vpack.c.b16 %v903_v18, %v902_v0  ;;  %v1265_v0 = vsel %vm1912_vm7, %v1263_v58, %v1264_v59 }
  0x78   : > { %v1275_v2 = vunpack.c.l.b16 %v1265_v0 }
  0x79   : > { %1654 = vmatmul.msk.bf16.vlgmr.msra.gmra.mxu3 %vm373_vm3, %v1166_v19  ;;  %v1277_v19 = vpack.c.b16 %v1271_v63, %v1270_v62  ;;  %v1262_v63 = vsel %vm1912_vm7, %v1665_v56, %v1261_v50 }
  0x7a   : > { %v1274_v1 = vunpack.c.l.b16 %v1262_v63 }
  0x7c   : > { %v1279_v4 = vpack.c.b16 %v1275_v2, %v1274_v1 }
  0x7f   : > { %1667 = vmatmul.msk.bf16.vlgmr.msra.gmra.mxu0 %vm373_vm3, %v1276_v53  ;;  %v1684_v53 = vld [vmem:[%s1850_s7 + $0x30] sm:$0xff] }
  0x81   : > { %1607 = vmatmul.msk.bf16.gmra.mxu1 %vm373_vm3, %v907_v26  ;;  %v1138_v26 = vrot.slane %v1136_v10, 5 }
  0x83   : > { %v1139_v37 = vor.u32 %v1138_v26, %v1135_v25 }
  0x85   : > { %1638 = vmatmul.msk.bf16.gmra.mxu2 %vm373_vm3, %v1683_v57  ;;  %v905_v57 = vunpack.c.l.b16 %v895_v40  ;;  %v1140_v45 = vrot.slane %v1139_v37, 4 }
  0x87   : > { %v909_v46 = vpack.c.b16 %v905_v57, %v904_v12  ;;  %v1145_v54 = vsel %vm1878_vm4, %v1140_v45, %v1144_v27 }
  0x88   : > { %v1164_v61 = vunpack.c.l.b16 %v1145_v54 }
  0x89   : > { %1655 = vmatmul.msk.bf16.gmra.mxu3 %vm373_vm3, %v1167_v14  ;;  %v1155_v14 = vsel %vm1878_vm4, %v1150_v47, %v1154_v48 }
  0x8a   : > { %v1165_v62 = vunpack.c.l.b16 %v1155_v14 }
  0x8c   : > { %v1169_v36 = vpack.c.b16 %v1165_v62, %v1164_v61  ;;  %v2207_v62 = vld [vmem:[%s2269_s2] ss:$0 sm:$0xff] }
  0x8f   : > { %1668 = vmatmul.msk.bf16.gmra.mxu0 %vm373_vm3, %v1277_v19 }
  0x91   : > { %1608 = vmatmul.msk.bf16.gmra.mxu1 %vm373_vm3, %v908_v6 }
  0x95   : > { %1639 = vmatmul.msk.bf16.gmra.mxu2 %vm373_vm3, %v1684_v53 }
  0x99   : > { %1656 = vmatmul.msk.bf16.gmra.mxu3 %vm373_vm3, %v1168_v34 }
  0x9e   : > { %v2141_v52 = vpop.f32.mrf.mxu1 }
  0x9f   : > { %1669 = vmatmul.msk.bf16.gmra.mxu0 %vm373_vm3, %v1278_v49 }
  0xa1   : > { %1609 = vmatmul.msk.bf16.gmra.mxu1 %vm373_vm3, %v909_v46 }
  0xa5   : > { %1640 = vmatmul.msk.bf16.gmra.mxu2 %vm373_vm3, %v1685_v60 }
  0xa6   : > { %v2155_v18 = vpop.f32.mrf.mxu1 }
  0xa8   : > { %v2157_v3 = vpop.f32.mrf.mxu2 }
  0xa9   : > { %1657 = vmatmul.msk.bf16.gmra.mxu3 %vm373_vm3, %v1169_v36 }
  0xac   : > { %v399_v5 = vpop.f32.mrf.mxu0  ;;  %v2160_v19 = vpop.f32.mrf.mxu3 }
  0xae   : > { %v463_v6 = vpop.f32.mrf.mxu1 }
  0xaf   : > { %1670 = vmatmul.msk.bf16.gmra.mxu0 %vm373_vm3, %v1279_v4  ;;  %v464_v38 = vadd.f32 %v463_v6, %v399_v5 }
  0xb0   : > { %v2163_v39 = vpop.f32.mrf.mxu2 }
  0xb4   : > { %v401_v7 = vpop.f32.mrf.mxu0  ;;  %v2165_v8 = vpop.f32.mrf.mxu3 }
  0xb6   : > { %v465_v42 = vpop.f32.mrf.mxu1 }
  0xb7   : > { %v466_v57 = vadd.f32 %v465_v42, %v401_v7 }
  0xb8   : > { %v564_v9 = vpop.f32.mrf.mxu2 }
  0xb9   : > { %v584_v35 = vadd.f32 %v564_v9, %v464_v38 }
  0xbc   : > { %v824_v10 = vpop.f32.mrf.mxu0  ;;  %v650_v13 = vpop.f32.mrf.mxu3 }
  0xbd   : > { %v670_v12 = vadd.f32 %v650_v13, %v584_v35 }
  0xbe   : > { %v468_v15 = vpop.f32.mrf.mxu1 }
  0xbf   : > { %v844_v49 = vadd.f32 %v824_v10, %v670_v12  ;;  %v469_v56 = vadd.f32 %v468_v15, %v2141_v52 }
  0xc0   : > { %v566_v16 = vpop.f32.mrf.mxu2 }
  0xc1   : > { %v585_v48 = vadd.f32 %v566_v16, %v466_v57 }
  0xc4   : > { %v826_v41 = vpop.f32.mrf.mxu0  ;;  %v652_v17 = vpop.f32.mrf.mxu3 }
  0xc5   : > { %v671_v54 = vadd.f32 %v652_v17, %v585_v48 }
  0xc6   : > { %v470_v20 = vpop.f32.mrf.mxu1 }
  0xc7   : > { %v845_v63 = vadd.f32 %v826_v41, %v671_v54  ;;  %v471_v6 = vadd.f32 %v470_v20, %v2155_v18 }
  0xc8   : > { %v569_v21 = vpop.f32.mrf.mxu2 }
  0xc9   : > { %v586_v60 = vadd.f32 %v569_v21, %v469_v56 }
  0xcc   : > { %v829_v22 = vpop.f32.mrf.mxu0  ;;  %v655_v23 = vpop.f32.mrf.mxu3 }
  0xcd   : > { %v672_v4 = vadd.f32 %v655_v23, %v586_v60 }
  0xce   : > { %v2167_v53 = vpop.f32.mrf.mxu1 }
  0xcf   : > { %v846_v15 = vadd.f32 %v829_v22, %v672_v4 }
  0xd0   : > { %v571_v24 = vpop.f32.mrf.mxu2 }
  0xd1   : > { %v587_v10 = vadd.f32 %v571_v24, %v471_v6 }
  0xd4   : > { %v2169_v25 = vpop.f32.mrf.mxu0  ;;  %v657_v26 = vpop.f32.mrf.mxu3 }
  0xd5   : > { %v673_v23 = vadd.f32 %v657_v26, %v587_v10 }
  0xd6   : > { %v2171_v27 = vpop.f32.mrf.mxu1 }
  0xd7   : > { %v847_v22 = vadd.f32 %v2169_v25, %v673_v23 }
  0xd8   : > { %v2173_v28 = vpop.f32.mrf.mxu2 }
  0xdc   : > { %v2175_v29 = vpop.f32.mrf.mxu0  ;;  %v2177_v32 = vpop.f32.mrf.mxu3 }
  0xde   : > { %v2179_v30 = vpop.f32.mrf.mxu1 }
  0xe0   : > { %v2181_v31 = vpop.f32.mrf.mxu2 }
  0xe4   : > { %v2183_v11 = vpop.f32.mrf.mxu0  ;;  %v2185_v33 = vpop.f32.mrf.mxu3 }
  0xe6   : > { %v2187_v34 = vpop.f32.mrf.mxu1 }
  0xe8   : > { %v2189_v37 = vpop.f32.mrf.mxu2 }
  0xec   : > { %v2191_v40 = vpop.f32.mrf.mxu0  ;;  %v2193_v55 = vpop.f32.mrf.mxu3 }
  0xee   : > { %v934_v43 = vpop.f32.mrf.mxu1 }
  0xef   : > { %v954_v46 = vadd.f32 %v934_v43, %v844_v49  ;;  %v474_v43 = vadd.f32 %v2167_v53, %v2157_v3  ;;  %v476_v3 = vadd.f32 %v2171_v27, %v2163_v39  ;;  %v479_v39 = vadd.f32 %v2179_v30, %v2160_v19 }
  0xf0   : > { %v2196_v44 = vpop.f32.mrf.mxu2  ;;  %v481_v19 = vadd.f32 %v2187_v34, %v2165_v8 }
  0xf1   : > { %v588_v24 = vadd.f32 %v2173_v28, %v474_v43  ;;  %v589_v56 = vadd.f32 %v2181_v31, %v476_v3 }
  0xf4   : > { %v2198_v45 = vpop.f32.mrf.mxu0  ;;  %v2200_v47 = vpop.f32.mrf.mxu3 }
  0xf6   : > { %v936_v50 = vpop.f32.mrf.mxu1 }
  0xf7   : > { %v955_v1 = vadd.f32 %v936_v50, %v845_v63  ;;  %v675_v63 = vadd.f32 %v2185_v33, %v589_v56 }
  0xf8   : > { %v1020_v51 = vpop.f32.mrf.mxu2 }
  0xf9   : > { %v1040_v14 = vadd.f32 %v1020_v51, %v954_v46  ;;  %v674_v46 = vadd.f32 %v2177_v32, %v588_v24  ;;  %v849_v4 = vadd.f32 %v2183_v11, %v675_v63 }
  0xfc   : > { %v1304_v58 = vpop.f32.mrf.mxu0  ;;  %v1194_v59 = vpop.f32.mrf.mxu3 }
  0xfd   : > { %v1214_v61 = vadd.f32 %v1194_v59, %v1040_v14 }
  0xfe   : > { %v939_v0 = vpop.f32.mrf.mxu1 }
  0xff   : > { %v1324_v36 = vadd.f32 %v1304_v58, %v1214_v61  ;;  %v956_v17 = vadd.f32 %v939_v0, %v846_v15  ;;  %v848_v58 = vadd.f32 %v2175_v29, %v674_v46 }
 0x100   : > { %v1022_v2 = vpop.f32.mrf.mxu2 }
 0x101   : > { %v1336_v5 = vadd.f32 %v2207_v62, %v1324_v36  ;;  %v1041_v52 = vadd.f32 %v1022_v2, %v955_v1  ;;  %v590_v2 = vadd.f32 %v2189_v37, %v479_v39 }
 0x103   : > { %v1344_v7 = vmax.f32 %v1336_v5, 0.0  ;;  %v676_v33 = vadd.f32 %v2193_v55, %v590_v2 }
 0x104   : > { %v1306_v42 = vpop.f32.mrf.mxu0  ;;  %v1196_v9 = vpop.f32.mrf.mxu3 }
 0x105   : > { %1352 = vst [vmem:[%s2213_s30] sm:$0xff] %v1344_v7  ;;  %v1215_v13 = vadd.f32 %v1196_v9, %v1041_v52  ;;  %v850_v15 = vadd.f32 %v2191_v40, %v676_v33 }
 0x106   : > { %v941_v16 = vpop.f32.mrf.mxu1 }
 0x107   : > { %v1325_v41 = vadd.f32 %v1306_v42, %v1215_v13  ;;  %v957_v50 = vadd.f32 %v941_v16, %v847_v22  ;;  %v591_v13 = vadd.f32 %v2196_v44, %v481_v19 }
 0x108   : > { %v1025_v21 = vpop.f32.mrf.mxu2 }
 0x109   : > { %v1337_v38 = vadd.f32 %v2207_v62, %v1325_v41  ;;  %v1042_v35 = vadd.f32 %v1025_v21, %v956_v17  ;;  %v677_v17 = vadd.f32 %v2200_v47, %v591_v13 }
 0x10b   : > { %v1345_v18 = vmax.f32 %v1337_v38, 0.0  ;;  %v851_v43 = vadd.f32 %v2198_v45, %v677_v17 }
 0x10c   : > { %v1309_v20 = vpop.f32.mrf.mxu0  ;;  %v1199_v12 = vpop.f32.mrf.mxu3 }
 0x10d   : > { %1353 = vst [vmem:[%s2213_s30 + $0x8] sm:$0xff] %v1345_v18  ;;  %v1216_v57 = vadd.f32 %v1199_v12, %v1042_v35 }
 0x10e   : > { %v944_v48 = vpop.f32.mrf.mxu1 }
 0x10f   : > { %v1326_v49 = vadd.f32 %v1309_v20, %v1216_v57  ;;  %v958_v60 = vadd.f32 %v944_v48, %v848_v58 }
 0x110   : > { %v1027_v26 = vpop.f32.mrf.mxu2 }
 0x111   : > { %v1338_v51 = vadd.f32 %v2207_v62, %v1326_v49  ;;  %v1043_v54 = vadd.f32 %v1027_v26, %v957_v50 }
 0x113   : > { %v1346_v53 = vmax.f32 %v1338_v51, 0.0 }
 0x114   : > { %v1311_v14 = vpop.f32.mrf.mxu0  ;;  %v1201_v28 = vpop.f32.mrf.mxu3 }
 0x115   : > { %1354 = vst [vmem:[%s2213_s30 + $0x10] sm:$0xff] %v1346_v53  ;;  %v1217_v25 = vadd.f32 %v1201_v28, %v1043_v54 }
 0x116   : > { %v946_v61 = vpop.f32.mrf.mxu1 }
 0x117   : > { %v1327_v59 = vadd.f32 %v1311_v14, %v1217_v25  ;;  %v959_v52 = vadd.f32 %v946_v61, %v849_v4 }
 0x118   : > { %v1030_v32 = vpop.f32.mrf.mxu2 }
 0x119   : > { %v1339_v0 = vadd.f32 %v2207_v62, %v1327_v59  ;;  %v1044_v36 = vadd.f32 %v1030_v32, %v958_v60 }
 0x11b   : > { %v1347_v27 = vmax.f32 %v1339_v0, 0.0 }
 0x11c   : > { %v1314_v1 = vpop.f32.mrf.mxu0  ;;  %v1204_v31 = vpop.f32.mrf.mxu3 }
 0x11d   : > { %1355 = vst [vmem:[%s2213_s30 + $0x18] sm:$0xff] %v1347_v27  ;;  %v1218_v29 = vadd.f32 %v1204_v31, %v1044_v36 }
 0x11e   : > { %v949_v9 = vpop.f32.mrf.mxu1 }
 0x11f   : > { %v1328_v5 = vadd.f32 %v1314_v1, %v1218_v29  ;;  %v960_v41 = vadd.f32 %v949_v9, %v850_v15 }
 0x120   : > { %v1032_v6 = vpop.f32.mrf.mxu2 }
 0x121   : > { %v1340_v7 = vadd.f32 %v2207_v62, %v1328_v5  ;;  %v1045_v42 = vadd.f32 %v1032_v6, %v959_v52 }
 0x123   : > { %v1348_v30 = vmax.f32 %v1340_v7, 0.0 }
 0x124   : > { %v1316_v10 = vpop.f32.mrf.mxu0  ;;  %v1206_v37 = vpop.f32.mrf.mxu3 }
 0x125   : > { %1356 = vst [vmem:[%s2213_s30 + $0x20] sm:$0xff] %v1348_v30  ;;  %v1219_v11 = vadd.f32 %v1206_v37, %v1045_v42 }
 0x126   : > { %v951_v34 = vpop.f32.mrf.mxu1 }
 0x127   : > { %v1329_v16 = vadd.f32 %v1316_v10, %v1219_v11  ;;  %v961_v40 = vadd.f32 %v951_v34, %v851_v43 }
 0x128   : > { %v1035_v55 = vpop.f32.mrf.mxu2 }
 0x129   : > { %v1341_v21 = vadd.f32 %v2207_v62, %v1329_v16  ;;  %v1046_v23 = vadd.f32 %v1035_v55, %v960_v41 }
 0x12b   : > { %v1349_v8 = vmax.f32 %v1341_v21, 0.0 }
 0x12c   : > { %v1319_v38 = vpop.f32.mrf.mxu0  ;;  %v1209_v35 = vpop.f32.mrf.mxu3 }
 0x12d   : > { %1357 = vst [vmem:[%s2213_s30 + $0x28] sm:$0xff] %v1349_v8  ;;  %v1220_v44 = vadd.f32 %v1209_v35, %v1046_v23 }
 0x12f   : > { %v1330_v18 = vadd.f32 %v1319_v38, %v1220_v44 }
 0x130   : > { %v1037_v20 = vpop.f32.mrf.mxu2 }
 0x131   : > { %v1342_v12 = vadd.f32 %v2207_v62, %v1330_v18  ;;  %v1047_v24 = vadd.f32 %v1037_v20, %v961_v40 }
 0x133   : > { %v1350_v47 = vmax.f32 %v1342_v12, 0.0 }
 0x134   : > { %v1211_v57 = vpop.f32.mrf.mxu3  ;;  %v1321_v48 = vpop.f32.mrf.mxu0 }
 0x135   : > { %1358 = vst [vmem:[%s2213_s30 + $0x30] sm:$0xff] %v1350_v47  ;;  %v1221_v22 = vadd.f32 %v1211_v57, %v1047_v24 }
 0x137   : > { %v1331_v49 = vadd.f32 %v1321_v48, %v1221_v22 }
 0x139   : > { %v1343_v50 = vadd.f32 %v2207_v62, %v1331_v49 }
 0x13b   : > { %v1351_v26 = vmax.f32 %v1343_v50, 0.0 }
 0x13d   : > { %1359 = vst [vmem:[%s2213_s30 + $0x38] sm:$0xff] %v1351_v26 }
 0x13e PF: > { %s13_s16 = sadd.s32 1, %s1769_s16   ;;  %s2275_s12 = smov %s1761_s14 }
 0x13f   : > { %p10_p7 = scmp.ge.s32.totalorder %s13_s16, 10   ;;  %s2276_s13 = smov %s1765_s15 }
 0x140   : > { %s2277_s14 = smov %s2280_s17  ;;  %s2278_s15 = smov %s2284_s18 }
 0x141   :  { %12 = sbr.rel (!%p10_p7) target bundleno = 3 (0x3), region = 79 }

</bundles_post_ra>
